<compile_context>
chip_gen: v7x
topology: tpu7x:2x2x1
jax: 0.10.0
libtpu: 0.0.40
codegen_flags: <defaults>
</compile_context>

<pallas_src>
import functools
import math

import jax
import jax.numpy as jnp
from jax import lax
from jax.experimental import pallas as pl
from jax.experimental.pallas import tpu as pltpu

NEG_INF = -1e30  # mask value; scores stay f32 (revisit if the score path changes dtype)


# ----------------------------------------------------------------------------
# Pass 1: fused Q/K/V projection + RoPE (hoisted out of the attention loop).
# ----------------------------------------------------------------------------
def qkv_rope_proj_kernel(x_ref, wqk_ref, wv_ref, rope_ref, q_ref, k_ref, v_ref,
                         *, head_size, scale):
    # x_ref:    (1, tp, E)      bf16
    # wqk_ref:  (E, 4H)         bf16  = [Wq | Wq_rot | Wk | Wk_rot]
    # wv_ref:   (E, hp)         bf16  = [Wv | 0-pad]
    # rope_ref: (tp, 2H)        f32   = [cos | sin]
    # q_ref/k_ref: (1, tp, H)   bf16 out;  v_ref: (1, tp, hp) bf16 out
    H = head_size
    x = x_ref[0]
    # Split the projection into two narrower dots (bounds f32 vreg pressure).
    qk = jnp.dot(x, wqk_ref[...], preferred_element_type=jnp.float32)      # (tp, 4H)
    cos = rope_ref[:, :H]
    sin = rope_ref[:, H:]
    # rotate_half folded into the weights -> RoPE is just two FMAs here (f32, v5e-safe).
    q = (qk[:, :H] * cos + qk[:, H:2 * H] * sin) * scale                   # pre-scaled q
    k = qk[:, 2 * H:3 * H] * cos + qk[:, 3 * H:] * sin
    q_ref[0] = q.astype(q_ref.dtype)
    k_ref[0] = k.astype(k_ref.dtype)
    v_ref[0] = jnp.dot(x, wv_ref[...],
                       preferred_element_type=jnp.float32).astype(v_ref.dtype)


# ----------------------------------------------------------------------------
# Pass 2: flash attention over the flattened lower-triangular block list.
# ----------------------------------------------------------------------------
def flash_attn_kernel(qi_tab_ref, ki_tab_ref, q_ref, k_ref, v_ref, o_ref,
                      m_scr, l_scr, acc_scr, *, tq, tk, hp):
    # qi_tab_ref/ki_tab_ref: (n_blocks,) int32 in SMEM (scalar-prefetched)
    # q_ref: (1, tq, H) bf16   k_ref: (1, tk, H) bf16   v_ref: (1, tk, hp) bf16
    # o_ref: (1, tq, hp)
    t = pl.program_id(1)
    qi = qi_tab_ref[t]
    ki = ki_tab_ref[t]
    row0 = qi * tq                 # first global query row of this block
    col_last = ki * tk + (tk - 1)  # last global key column of this block

    @pl.when(ki == 0)
    def _init():
        # Reset online-softmax state at the start of each q-tile group.
        m_scr[...] = jnp.full(m_scr.shape, -jnp.inf, jnp.float32)
        l_scr[...] = jnp.zeros(l_scr.shape, jnp.float32)
        acc_scr[...] = jnp.zeros(acc_scr.shape, jnp.float32)

    def _accumulate(apply_mask):
        # scores = (q / sqrt(H)) @ k^T, f32 accumulation on the MXU.
        s = lax.dot_general(q_ref[0], k_ref[0], (((1,), (1,)), ((), ())),
                            preferred_element_type=jnp.float32)            # (tq, tk)
        if apply_mask:  # only blocks straddling the diagonal pay for the mask
            rows = row0 + lax.broadcasted_iota(jnp.int32, (tq, tk), 0)
            cols = ki * tk + lax.broadcasted_iota(jnp.int32, (tq, tk), 1)
            s = jnp.where(rows >= cols, s, NEG_INF)
        m_prev = m_scr[...]
        m_new = jnp.maximum(m_prev, jnp.max(s, axis=-1, keepdims=True))
        alpha = jnp.exp(m_prev - m_new)
        p = jnp.exp(s - m_new)
        l_scr[...] = alpha * l_scr[...] + jnp.sum(p, axis=-1, keepdims=True)
        acc_scr[...] = alpha * acc_scr[...] + jnp.dot(
            p.astype(jnp.bfloat16), v_ref[0], preferred_element_type=jnp.float32)
        m_scr[...] = m_new

    @pl.when(col_last <= row0)    # block fully at/below the diagonal: no mask ops
    def _unmasked():
        _accumulate(apply_mask=False)

    @pl.when(col_last > row0)     # block straddles the diagonal: mask above-diagonal
    def _masked():
        _accumulate(apply_mask=True)

    # Last contributing KV block of this q-tile group: normalize and emit.
    last_ki = (qi * tq + tq - 1) // tk
    @pl.when(ki == last_ki)
    def _finalize():
        # Deferred normalization with the EXACT reciprocal (O(tq) EUP work).
        inv_l = pl.reciprocal(l_scr[...], approx=False)
        o_ref[0] = (acc_scr[...] * inv_l).astype(o_ref.dtype)


# ----------------------------------------------------------------------------
# Wrapper
# ----------------------------------------------------------------------------
def causal_self_attention_head(x, wq, wk, wv, *, block_q=128, block_kv=128):
    """x: (B, S, E) f32; wq/wk/wv: (E, H) f32. Returns (B, S, H) f32."""
    B, S, E = x.shape
    H = wq.shape[1]
    assert H % 2 == 0 and H <= 128
    half = H // 2
    hp = 128  # lane-dense padded width for V / output (unmasked vst stores)

    tq = min(block_q, S)
    tk = min(block_kv, S)
    assert S % tq == 0 and S % tk == 0

    # RoPE tables fused as [cos | sin] along the last dim: (S, 2H), f32.
    inv_freq = 1.0 / (10000.0 ** (jnp.arange(0, H, 2, dtype=jnp.float32) / H))
    pos = jnp.arange(S, dtype=jnp.float32)
    freqs = pos[:, None] * inv_freq[None, :]                        # (S, H/2)
    emb = jnp.concatenate([freqs, freqs], axis=-1)                  # (S, H)
    rope = jnp.concatenate([jnp.cos(emb), jnp.sin(emb)], axis=-1)   # (S, 2H)

    # rotate_half folded into the projection weights: x @ rot_cols(W) == rotate_half(x @ W)
    def rot_cols(w):
        return jnp.concatenate([-w[:, half:], w[:, :half]], axis=1)

    wqk = jnp.concatenate([wq, rot_cols(wq), wk, rot_cols(wk)], axis=1).astype(jnp.bfloat16)
    wv_pad = jnp.concatenate([wv, jnp.zeros((E, hp - H), wv.dtype)],
                             axis=1).astype(jnp.bfloat16)
    x_bf = x.astype(jnp.bfloat16)

    # ---- Pass 1: QKV projection + RoPE, once per row (O(S*E), not O(S^2*E)). ----
    tp = tq
    proj_kernel = functools.partial(qkv_rope_proj_kernel, head_size=H,
                                    scale=1.0 / math.sqrt(H))
    q_all, k_all, v_all = pl.pallas_call(
        proj_kernel,
        out_shape=(jax.ShapeDtypeStruct((B, S, H), jnp.bfloat16),
                   jax.ShapeDtypeStruct((B, S, H), jnp.bfloat16),
                   jax.ShapeDtypeStruct((B, S, hp), jnp.bfloat16)),
        grid=(B, S // tp),
        in_specs=[
            pl.BlockSpec((1, tp, E), lambda b, i: (b, i, 0)),       # x rows
            pl.BlockSpec((E, 4 * H), lambda b, i: (0, 0)),          # [Wq|Wq_rot|Wk|Wk_rot]
            pl.BlockSpec((E, hp), lambda b, i: (0, 0)),             # [Wv | 0-pad]
            pl.BlockSpec((tp, 2 * H), lambda b, i: (i, 0)),         # rope rows
        ],
        out_specs=(
            pl.BlockSpec((1, tp, H), lambda b, i: (b, i, 0)),
            pl.BlockSpec((1, tp, H), lambda b, i: (b, i, 0)),
            pl.BlockSpec((1, tp, hp), lambda b, i: (b, i, 0)),
        ),
        compiler_params=pltpu.CompilerParams(
            dimension_semantics=("parallel", "parallel"),
            vmem_limit_bytes=32 * 1024 * 1024,
        ),
    )(x_bf, wqk, wv_pad, rope)

    # ---- Pass 2: flash attention over the lower-triangular block list. ----
    n_q = S // tq
    qi_list, ki_list = [], []
    for qi in range(n_q):
        last_ki = (qi * tq + tq - 1) // tk
        for ki in range(last_ki + 1):
            qi_list.append(qi)
            ki_list.append(ki)
    qi_ids = jnp.asarray(qi_list, dtype=jnp.int32)
    ki_ids = jnp.asarray(ki_list, dtype=jnp.int32)
    n_blocks = len(qi_list)

    kernel = functools.partial(flash_attn_kernel, tq=tq, tk=tk, hp=hp)
    grid_spec = pltpu.PrefetchScalarGridSpec(
        num_scalar_prefetch=2,
        grid=(B, n_blocks),
        in_specs=[
            pl.BlockSpec((1, tq, H), lambda b, t, qi_tab, ki_tab: (b, qi_tab[t], 0)),
            pl.BlockSpec((1, tk, H), lambda b, t, qi_tab, ki_tab: (b, ki_tab[t], 0)),
            pl.BlockSpec((1, tk, hp), lambda b, t, qi_tab, ki_tab: (b, ki_tab[t], 0)),
        ],
        out_specs=pl.BlockSpec((1, tq, hp), lambda b, t, qi_tab, ki_tab: (b, qi_tab[t], 0)),
        scratch_shapes=[
            pltpu.VMEM((tq, 1), jnp.float32),    # running max
            pltpu.VMEM((tq, 1), jnp.float32),    # running denominator
            pltpu.VMEM((tq, hp), jnp.float32),   # un-normalized output accumulator
        ],
    )
    out_padded = pl.pallas_call(
        kernel,
        out_shape=jax.ShapeDtypeStruct((B, S, hp), x.dtype),
        grid_spec=grid_spec,
        compiler_params=pltpu.CompilerParams(
            # Batch axis independent (megacore on v7x); the flattened causal axis
            # carries the online-softmax state and must stay sequential.
            dimension_semantics=("parallel", "arbitrary"),
            vmem_limit_bytes=32 * 1024 * 1024,
        ),
    )(qi_ids, ki_ids, q_all, k_all, v_all)

    # TODO(synk): attention dropout (attn_drop_value) omitted — eval/deterministic path.
    # Note: a fused downstream consumer should take out_padded directly (lane-dense,
    # width 128) and avoid this extra slice pass; we slice to match the module's shape.
    return out_padded[..., :H]


def _reference(x, wq, wk, wv):
    """Pure-JAX f32 reference mirroring the PyTorch module's forward."""
    B, S, E = x.shape
    H = wq.shape[1]
    half = H // 2
    q, k, v = x @ wq, x @ wk, x @ wv
    inv_freq = 1.0 / (10000.0 ** (jnp.arange(0, H, 2, dtype=jnp.float32) / H))
    pos = jnp.arange(S, dtype=jnp.float32)
    emb = jnp.concatenate([pos[:, None] * inv_freq[None, :]] * 2, axis=-1)
    cos, sin = jnp.cos(emb), jnp.sin(emb)
    rot = lambda u: jnp.concatenate([-u[..., half:], u[..., :half]], axis=-1)
    q = q * cos + rot(q) * sin
    k = k * cos + rot(k) * sin
    s = jnp.einsum("bqh,bkh->bqk", q, k) / math.sqrt(H)
    s = jnp.where(jnp.tril(jnp.ones((S, S), dtype=bool)), s, -jnp.inf)
    p = jax.nn.softmax(s, axis=-1)
    return jnp.einsum("bqk,bkh->bqh", p, v)


if __name__ == "__main__":
    def check(B, S, E, H, block_q, block_kv):
        key = jax.random.PRNGKey(0)
        key_x, key_q, key_k, key_v = jax.random.split(key, 4)
        x = jax.random.normal(key_x, (B, S, E), dtype=jnp.float32)
        # Deterministic synthetic weights (nn.Linear(E, H, bias=False), stored transposed).
        wq = jax.random.normal(key_q, (E, H), dtype=jnp.float32) * 0.02
        wk = jax.random.normal(key_k, (E, H), dtype=jnp.float32) * 0.02
        wv = jax.random.normal(key_v, (E, H), dtype=jnp.float32) * 0.02

        out = causal_self_attention_head(x, wq, wk, wv,
                                         block_q=block_q, block_kv=block_kv)
        jax.block_until_ready(out)
        assert out.shape == (B, S, H) and out.dtype == jnp.float32

        ref = _reference(x, wq, wk, wv)
        max_err = float(jnp.max(jnp.abs(out - ref)))
        assert max_err < 2e-2, (
            f"max |kernel - reference| = {max_err} (B={B}, S={S}, E={E}, H={H})")

    # Small config matching the module: batch=2, context_len=8, n_embed=32, head_size=16.
    check(2, 8, 32, 16, 128, 128)
    # Multi-block causal path: flattened lower-triangular grid with 8-row tiles over S=16
    # (exercises init / unmasked off-diagonal / masked diagonal / finalize branches).
    check(2, 16, 32, 16, 8, 8)
    print("KERNEL_OK")
</pallas_src>

<mosaic_0001>
module attributes {stable_mosaic.version = 11 : i64} {
  func.func @qkv_rope_proj_kernel(%arg0: i32, %arg1: i32, %arg2: memref<1x8x32xbf16, #tpu.memory_space<vmem>>, %arg3: memref<32x64xbf16, #tpu.memory_space<vmem>>, %arg4: memref<32x128xbf16, #tpu.memory_space<vmem>>, %arg5: memref<8x32xf32, #tpu.memory_space<vmem>>, %arg6: memref<1x8x16xbf16, #tpu.memory_space<vmem>>, %arg7: memref<1x8x16xbf16, #tpu.memory_space<vmem>>, %arg8: memref<1x8x128xbf16, #tpu.memory_space<vmem>>) attributes {dimension_semantics = [#tpu.dimension_semantics<parallel>, #tpu.dimension_semantics<parallel>], iteration_bounds = array<i64: 2, 1>, scalar_prefetch = 0 : i64, scratch_operands = 0 : i64, tpu.core_type = #tpu.core_type<tc>, window_params = [{transform_indices = @transform_0, window_bounds = array<i64: 1, 8, 32>}, {pipeline_mode = #tpu.pipeline_mode<synchronous>, transform_indices = @transform_1, window_bounds = array<i64: 32, 64>}, {pipeline_mode = #tpu.pipeline_mode<synchronous>, transform_indices = @transform_2, window_bounds = array<i64: 32, 128>}, {transform_indices = @transform_3, window_bounds = array<i64: 8, 32>}, {transform_indices = @transform_4, window_bounds = array<i64: 1, 8, 16>}, {transform_indices = @transform_5, window_bounds = array<i64: 1, 8, 16>}, {transform_indices = @transform_6, window_bounds = array<i64: 1, 8, 128>}]} {
    %c0 = arith.constant 0 : index
    %c0_0 = arith.constant 0 : index
    %c0_1 = arith.constant 0 : index
    %0 = vector.load %arg2[%c0, %c0_0, %c0_1] : memref<1x8x32xbf16, #tpu.memory_space<vmem>>, vector<1x8x32xbf16>
    %1 = vector.shape_cast %0 : vector<1x8x32xbf16> to vector<8x32xbf16>
    %c0_2 = arith.constant 0 : index
    %c0_3 = arith.constant 0 : index
    %2 = vector.load %arg3[%c0_2, %c0_3] : memref<32x64xbf16, #tpu.memory_space<vmem>>, vector<32x64xbf16>
    %cst = arith.constant dense<0.000000e+00> : vector<8x64xf32>
    %3 = tpu.matmul %1, %2, %cst {dimension_numbers = #tpu.dot_dimension_numbers<[1], [0], [0], [1], [0, 0, 1, 1], [], []>} : vector<8x32xbf16>, vector<32x64xbf16>, vector<8x64xf32> -> vector<8x64xf32>
    %c0_4 = arith.constant 0 : index
    %c0_5 = arith.constant 0 : index
    %4 = vector.load %arg5[%c0_4, %c0_5] : memref<8x32xf32, #tpu.memory_space<vmem>>, vector<8x16xf32>
    %c0_6 = arith.constant 0 : index
    %c16 = arith.constant 16 : index
    %5 = vector.load %arg5[%c0_6, %c16] : memref<8x32xf32, #tpu.memory_space<vmem>>, vector<8x16xf32>
    %6 = vector.extract_strided_slice %3 {offsets = [0, 0], sizes = [8, 16], strides = [1, 1]} : vector<8x64xf32> to vector<8x16xf32>
    %7 = arith.mulf %6, %4 : vector<8x16xf32>
    %8 = vector.extract_strided_slice %3 {offsets = [0, 16], sizes = [8, 16], strides = [1, 1]} : vector<8x64xf32> to vector<8x16xf32>
    %9 = arith.mulf %8, %5 : vector<8x16xf32>
    %10 = arith.addf %7, %9 : vector<8x16xf32>
    %cst_7 = arith.constant 2.500000e-01 : f32
    %11 = vector.broadcast %cst_7 : f32 to vector<8x16xf32>
    %12 = arith.mulf %10, %11 : vector<8x16xf32>
    %13 = vector.extract_strided_slice %3 {offsets = [0, 32], sizes = [8, 16], strides = [1, 1]} : vector<8x64xf32> to vector<8x16xf32>
    %14 = arith.mulf %13, %4 : vector<8x16xf32>
    %15 = vector.extract_strided_slice %3 {offsets = [0, 48], sizes = [8, 16], strides = [1, 1]} : vector<8x64xf32> to vector<8x16xf32>
    %16 = arith.mulf %15, %5 : vector<8x16xf32>
    %17 = arith.addf %14, %16 : vector<8x16xf32>
    %18 = arith.truncf %12 : vector<8x16xf32> to vector<8x16xbf16>
    %c0_8 = arith.constant 0 : index
    %c0_9 = arith.constant 0 : index
    %c0_10 = arith.constant 0 : index
    %19 = vector.load %arg6[%c0_8, %c0_9, %c0_10] : memref<1x8x16xbf16, #tpu.memory_space<vmem>>, vector<1x8x16xbf16>
    %20 = vector.shape_cast %19 : vector<1x8x16xbf16> to vector<8x16xbf16>
    %21 = vector.shape_cast %18 : vector<8x16xbf16> to vector<1x8x16xbf16>
    tpu.vector_store %arg6[%c0_8, %c0_9, %c0_10], %21 {strides = array<i32>} : memref<1x8x16xbf16, #tpu.memory_space<vmem>>, vector<1x8x16xbf16>,
    %22 = arith.truncf %17 : vector<8x16xf32> to vector<8x16xbf16>
    %c0_11 = arith.constant 0 : index
    %c0_12 = arith.constant 0 : index
    %c0_13 = arith.constant 0 : index
    %23 = vector.load %arg7[%c0_11, %c0_12, %c0_13] : memref<1x8x16xbf16, #tpu.memory_space<vmem>>, vector<1x8x16xbf16>
    %24 = vector.shape_cast %23 : vector<1x8x16xbf16> to vector<8x16xbf16>
    %25 = vector.shape_cast %22 : vector<8x16xbf16> to vector<1x8x16xbf16>
    tpu.vector_store %arg7[%c0_11, %c0_12, %c0_13], %25 {strides = array<i32>} : memref<1x8x16xbf16, #tpu.memory_space<vmem>>, vector<1x8x16xbf16>,
    %c0_14 = arith.constant 0 : index
    %c0_15 = arith.constant 0 : index
    %26 = vector.load %arg4[%c0_14, %c0_15] : memref<32x128xbf16, #tpu.memory_space<vmem>>, vector<32x128xbf16>
    %cst_16 = arith.constant dense<0.000000e+00> : vector<8x128xf32>
    %27 = tpu.matmul %1, %26, %cst_16 {dimension_numbers = #tpu.dot_dimension_numbers<[1], [0], [0], [1], [0, 0, 1, 1], [], []>} : vector<8x32xbf16>, vector<32x128xbf16>, vector<8x128xf32> -> vector<8x128xf32>
    %28 = arith.truncf %27 : vector<8x128xf32> to vector<8x128xbf16>
    %c0_17 = arith.constant 0 : index
    %c0_18 = arith.constant 0 : index
    %c0_19 = arith.constant 0 : index
    %29 = vector.load %arg8[%c0_17, %c0_18, %c0_19] : memref<1x8x128xbf16, #tpu.memory_space<vmem>>, vector<1x8x128xbf16>
    %30 = vector.shape_cast %29 : vector<1x8x128xbf16> to vector<8x128xbf16>
    %31 = vector.shape_cast %28 : vector<8x128xbf16> to vector<1x8x128xbf16>
    tpu.vector_store %arg8[%c0_17, %c0_18, %c0_19], %31 {strides = array<i32>} : memref<1x8x128xbf16, #tpu.memory_space<vmem>>, vector<1x8x128xbf16>,
    return
  }
  func.func @transform_0(%arg0: i32, %arg1: i32) -> (i32, i32, i32) {
    %c0_i32 = arith.constant 0 : i32
    %c0_i32_0 = arith.constant 0 : i32
    return %arg0, %arg1, %c0_i32 : i32, i32, i32
  }
  func.func @transform_1(%arg0: i32, %arg1: i32) -> (i32, i32) {
    %c0_i32 = arith.constant 0 : i32
    %c0_i32_0 = arith.constant 0 : i32
    %c0_i32_1 = arith.constant 0 : i32
    return %c0_i32, %c0_i32_0 : i32, i32
  }
  func.func @transform_2(%arg0: i32, %arg1: i32) -> (i32, i32) {
    %c0_i32 = arith.constant 0 : i32
    %c0_i32_0 = arith.constant 0 : i32
    %c0_i32_1 = arith.constant 0 : i32
    return %c0_i32, %c0_i32_0 : i32, i32
  }
  func.func @transform_3(%arg0: i32, %arg1: i32) -> (i32, i32) {
    %c0_i32 = arith.constant 0 : i32
    %c0_i32_0 = arith.constant 0 : i32
    return %arg1, %c0_i32 : i32, i32
  }
  func.func @transform_4(%arg0: i32, %arg1: i32) -> (i32, i32, i32) {
    %c0_i32 = arith.constant 0 : i32
    %c0_i32_0 = arith.constant 0 : i32
    return %arg0, %arg1, %c0_i32 : i32, i32, i32
  }
  func.func @transform_5(%arg0: i32, %arg1: i32) -> (i32, i32, i32) {
    %c0_i32 = arith.constant 0 : i32
    %c0_i32_0 = arith.constant 0 : i32
    return %arg0, %arg1, %c0_i32 : i32, i32, i32
  }
  func.func @transform_6(%arg0: i32, %arg1: i32) -> (i32, i32, i32) {
    %c0_i32 = arith.constant 0 : i32
    %c0_i32_0 = arith.constant 0 : i32
    return %arg0, %arg1, %c0_i32 : i32, i32, i32
  }
}

</mosaic_0001>

<bundles_post_ra>
// kernel: tpu_custom_call.1
= control target key start
LH: loop header
LB: loop body
LE: loop exit
PB: predicated region body
PF: predicated region fallthrough
CT: control target
= control target key end

     0   :  { %s1502_s0 = inlined_call_operand.hbm [shape: bf16[2,8,32], index: 0, kind: input, shape index: {}]   ;;  %s1503_s1 = inlined_call_operand.hbm [shape: bf16[32,64], index: 1, kind: input, shape index: {}]   ;;  %s1504_s2 = inlined_call_operand.hbm [shape: bf16[32,128], index: 2, kind: input, shape index: {}]   ;;  %s1505_s3 = inlined_call_operand.vmem [shape: f32[8,32], index: 3, kind: input, shape index: {}]   ;;  %s1506_s4 = inlined_call_operand.hbm [shape: bf16[2,8,16], index: 4, kind: output, shape index: {0}]   ;;  %s1507_s5 = inlined_call_operand.hbm [shape: bf16[2,8,16], index: 5, kind: output, shape index: {1}]   ;;  %s1508_s6 = inlined_call_operand.hbm [shape: bf16[2,8,128], index: 6, kind: output, shape index: {2}]  }
   0x1   :  { %1513 = sst [smem:[#allocation16_spill]] %s1502_s0 }
   0x2   :  { %12 = vsyncpa [#allocation3], 0 }
   0x3   :  { %14 = vsyncpa [#allocation3 + $0x1], 0 }
   0x4   :  { %15 = vsyncpa [#allocation6], 0 }
   0x5   :  { %16 = vsyncpa [#allocation4], 0 }
   0x6   :  { %18 = vsyncpa [#allocation4 + $0x1], 0 }
   0x7   :  { %19 = vsyncpa [#allocation10], 0 }
   0x8   :  { %21 = vsyncpa [#allocation10 + $0x1], 0  ;;  %s1171_s21 = smov 0   ;;  %s1173_s22 = smov 0  }
   0x9   :  { %s1175_s23 = smov 0   ;;  %s1177_s24 = smov 0  }
   0xa   :  { %s1179_s25 = smov 0   ;;  %s1181_s26 = smov 0  }
   0xb LB: > { %s1202_s27 = sadd.s32 4294967295, %s1121_s26   ;;  %s1510_s28 = sadd.s32 4294967294, %s1121_s26   ;;  %s1121_s26 = sphi %s1181_s26, %s27_s26   ;;  %s1117_s25 = sphi %s1179_s25, %s1533_s25   ;;  %s1113_s24 = sphi %s1177_s24, %s1532_s24   ;;  %s1109_s23 = sphi %s1175_s23, %s1531_s23   ;;  %s1105_s22 = sphi %s1173_s22, %s1530_s22   ;;  %s1101_s21 = sphi %s1171_s21, %s1529_s21  }
   0xc   : > { %p61_p0 = scmp.ne.s32.totalorder %s1105_s22, %s1101_s21  ;;  %p1509_p1 = scmp.eq.s32.totalorder %s1202_s27, 0 }
   0xd   : > { %p161_p3 = scmp.eq.s32.totalorder %s1510_s28, 1  ;;  %p733_p5 = scmp.ge.s32.totalorder %s1121_s26, 1 }
   0xe   : > { %p1213_p4 = por %p1509_p1, %p61_p0  ;;  %p224_p7 = scmp.lt.s32.totalorder %s1121_s26, 3 }
   0xf   : > { %p1218_p6 = por %p161_p3, %p61_p0  ;;  %s1123_s8 = smov [#allocation5]  }
  0x10   : > { %s1514_s29 = scalar_select %p1213_p4, 1, 0 }
  0x11   : > { %s1515_s30 = scalar_select %p1218_p6, 1, 0 }
  0x12   : > { %p1223_p8 = pnand %p733_p5, %p224_p7  ;;  %s236_s9 = sshll.u32 %s1123_s8, 4  ;;  %s1227_s9 = int_to_ptr.vmem [resolvable:$true] %s236_s9 }
  0x13   : > { %s1124_s11 = smov [#allocation7]   ;;  %s889_s15 = scalar_lea.hbm %s1503_s1, 256 }
  0x14   : > { %p801_p9 = pneg %p1223_p8  ;;  %s249_s12 = sshll.u32 %s1124_s11, 4  ;;  %s1238_s12 = int_to_ptr.vmem [resolvable:$true] %s249_s12 }
  0x15   : > { %p890_p12 = scmp.ne.s32.totalorder %s1503_s1, %s889_s15  ;;  %p896_p5 = scmp.lt.u32.totalorder %s889_s15, %s1503_s1 }
  0x16   : > { %p1234_p11 = pnand %p801_p9, %p1509_p1 }
  0x18   : > { %p891_p13 = pneg %p1234_p11 }
  0x1a   : > { %p892_p0 = pnand %p891_p13, %p890_p12 }
  0x1c   : > { %p893_p3 = pneg %p892_p0 }
  0x1e   : > { %p898_p7 = pnand %p896_p5, %p893_p3 }
  0x20   : > { %901 = shalt.err (!%p898_p7)
}
  0x21   : > { %s902_s20 = scalar_lea.vmem %s1227_s9, 256  ;;  %p910_p2 = scmp.lt.s32.totalorder %s1227_s9, %s1227_s9 }
  0x22   : > { %p903_p9 = scmp.ne.s32.totalorder %s1227_s9, %s902_s20  ;;  %p911_p12 = scmp.lt.s32.totalorder %s902_s20, %s902_s20 }
  0x24   : > { %p905_p10 = pnand %p903_p9, %p891_p13  ;;  %p912_p0 = por %p911_p12, %p910_p2 }
  0x26   : > { %p906_p1 = pneg %p905_p10 }
  0x28   : > { %p913_p6 = pnand %p912_p0, %p906_p1 }
  0x2a   : > { %916 = shalt.err (!%p913_p6)
}
  0x2b   : > { %s1125_s8 = smov 64   ;;  %s1126_s11 = smov 4  }
  0x2c   : > { %804 = dma.hbm_to_vmem [thread:$0]  (!%p1234_p11), %s1503_s1, 256, %s1227_s9, [#allocation6], %s1125_s8, %s1125_s8, %s1126_s11  }
  0x2d   : > { %s917_s17 = scalar_lea.hbm %s1504_s2, 256 }
  0x2e   : > { %p918_p2 = scmp.ne.s32.totalorder %s1504_s2, %s917_s17  ;;  %p924_p10 = scmp.lt.u32.totalorder %s917_s17, %s1504_s2 }
  0x30   : > { %p920_p1 = pnand %p918_p2, %p891_p13 }
  0x32   : > { %p921_p6 = pneg %p920_p1 }
  0x34   : > { %p926_p3 = pnand %p924_p10, %p921_p6 }
  0x36   : > { %929 = shalt.err (!%p926_p3)
}
  0x37   : > { %s930_s9 = scalar_lea.vmem %s1238_s12, 256  ;;  %p938_p12 = scmp.lt.s32.totalorder %s1238_s12, %s1238_s12 }
  0x38   : > { %p931_p5 = scmp.ne.s32.totalorder %s1238_s12, %s930_s9  ;;  %p939_p0 = scmp.lt.s32.totalorder %s930_s9, %s930_s9 }
  0x3a   : > { %p933_p7 = pnand %p931_p5, %p891_p13  ;;  %p940_p2 = por %p939_p0, %p938_p12 }
  0x3c   : > { %p934_p9 = pneg %p933_p7 }
  0x3e   : > { %p941_p1 = pnand %p940_p2, %p934_p9 }
  0x40   : > { %944 = shalt.err (!%p941_p1)
}
  0x41   : > { %807 = dma.hbm_to_vmem [thread:$0]  (!%p1234_p11), %s1504_s2, 256, %s1238_s12, [#allocation6], %s1125_s8, %s1125_s8, %s1126_s11  }
  0x42   : > { %s39_s14 = sadd.s32 1, %s1117_s25  ;;  %s48_s15 = sadd.s32 1, %s1109_s23 }
  0x43   : > { %p41_p13 = scmp.ge.s32.totalorder %s39_s14, 2  ;;  %p55_p6 = scmp.ne.s32.totalorder %s1109_s23, %s1105_s22 }
  0x44   : > { %p56_p10 = scmp.eq.s32.totalorder %s1121_s26, 0  ;;  %p824_p3 = scmp.lt.s32.totalorder %s1121_s26, 2 }
  0x45   : > { %s1535_s14 = smov (%p41_p13, %s39_s14), 0  ;;  %p1518_p7 = scmp.eq.s32.totalorder %s1202_s27, 1 }
  0x46   : > { %p57_p5 = por %p56_p10, %p55_p6  ;;  %s43_s16 = ssub.s32 %s1117_s25, %s1535_s14 }
  0x47   : > { %p1302_p9 = por %p1518_p7, %p55_p6  ;;  %s270_s17 = sand.u32 1, %s1109_s23  }
  0x48   : > { %p46_p12 = scmp.eq.s32.totalorder %s43_s16, 0  ;;  %s738_s12 = sshll.u32 %s270_s17, 2 }
  0x49   : > { %s1519_s10 = scalar_select %p1302_p9, 1, 0 }
  0x4a   : > { %s739_s8 = sshll.u32 %s1117_s25, 6  ;;  %s1520_s0 = sld [smem:[#allocation16_spill]] }
  0x4b   : > { %s1311_s11 = scalar_select %p46_p12, %s1109_s23, %s48_s15  }
  0x4c   : > { %s274_s9 = scalar_lea.vmem [#allocation2], %s738_s12  ;;  %p1320_p11 = pnand %p824_p3, %p57_p5 }
  0x4d   : > { %s282_s28 = sshll.u32 %s274_s9, 4  ;;  %s271_s15 = scalar_lea.sflag [#allocation3], %s270_s17  ;;  %s1324_s28 = int_to_ptr.vmem [resolvable:$true] %s282_s28 }
  0x4e   : > { %p947_p2 = pneg %p1320_p11 }
  0x50   : > { %s1316_s20 = scalar_lea.hbm %s1520_s0, %s739_s8  ;;  %s950_s18 = scalar_lea.hbm %s1520_s0, 128 }
  0x51   : > { %s945_s16 = scalar_lea.hbm %s1316_s20, 64  ;;  %p951_p6 = scmp.lt.u32.totalorder %s1316_s20, %s1520_s0 }
  0x52   : > { %p946_p0 = scmp.ne.s32.totalorder %s1316_s20, %s945_s16  ;;  %p952_p10 = scmp.lt.u32.totalorder %s950_s18, %s945_s16 }
  0x53   : > { %p954_p5 = scmp.lt.u32.totalorder %s945_s16, %s1316_s20 }
  0x54   : > { %p948_p1 = pnand %p947_p2, %p946_p0  ;;  %p953_p3 = por %p952_p10, %p951_p6 }
  0x56   : > { %p949_p13 = pneg %p948_p1  ;;  %p955_p7 = por %p954_p5, %p953_p3 }
  0x58   : > { %p956_p12 = pnand %p955_p7, %p949_p13 }
  0x5a   : > { %959 = shalt.err (!%p956_p12)
}
  0x5b   : > { %s960_s17 = scalar_lea.vmem %s1324_s28, 64  ;;  %s1127_s12 = smov [#allocation2]  }
  0x5c   : > { %p961_p0 = scmp.ne.s32.totalorder %s1324_s28, %s960_s17  ;;  %s965_s8 = sshll.u32 %s1127_s12, 4  ;;  %s966_s8 = int_to_ptr.vmem [resolvable:$false] %s965_s8 }
  0x5d   : > { %s967_s19 = scalar_lea.vmem %s966_s8, 128  ;;  %p968_p4 = scmp.lt.s32.totalorder %s1324_s28, %s966_s8 }
  0x5e   : > { %p963_p1 = pnand %p961_p0, %p947_p2  ;;  %p969_p6 = scmp.lt.s32.totalorder %s967_s19, %s960_s17 }
  0x60   : > { %p964_p9 = pneg %p963_p1  ;;  %p970_p10 = por %p969_p6, %p968_p4 }
  0x62   : > { %p971_p3 = pnand %p970_p10, %p964_p9 }
  0x64   : > { %974 = shalt.err (!%p971_p3)
}
  0x65   : > { %811 = dma.hbm_to_vmem [thread:$0]  (!%p1320_p11), %s1316_s20, 64, %s1324_s28, %s271_s15  }
  0x66   : > { %291 = sbr.rel (%p1223_p8) target bundleno = 607 (0x25f), region = 36  ;;  %s1354_s16 = sand.u32 (!%p1223_p8), 1, %s1105_s22  }
  0x67   : > { %s1357_s18 = sshll.u32 (!%p1223_p8), %s1354_s16, 2  ;;  %s294_s9 = scalar_lea.sflag (!%p1223_p8), [#allocation3], %s1354_s16 }
  0x68   : > { %s297_s17 = scalar_lea.vmem (!%p1223_p8), [#allocation2], %s1357_s18  ;;  %p1522_p4 = scmp.ne.s32.totalorder (!%p1223_p8), %s1514_s29, 0 }
  0x6d   : > { %1084 = dma.done.wait (%p1522_p4), %s294_s9, 64  }
  0x6e   : > { %1086 = vsyncadd (%p1522_p4), %s294_s9, 4294967232  ;;  %p1523_p9 = scmp.eq.s32.totalorder %s1202_s27, 0 }
  0x70   : > { %1088 = dma.done.wait (%p1523_p9), [#allocation6], 512   ;;  %p1524_p8 = pmov %p1523_p9 }
  0x71   : > { %v1128_v0 = vmov 0.0   ;;  %vm1129_vm0 = vmmov 0   ;;  %v885_v1 = vld [vmem:[#allocation5] sm:$0xff]   ;;  %v886_v2 = vld [vmem:[#allocation5 + $0x8] sm:$0xff]   ;;  %v414_v3 = vld [vmem:[%s1505_s3] sm:$0xff]  ;;  %s1130_s29 = smov 32  }
  0x72   : > { %1090 = vsyncadd (%p1524_p8), [#allocation6], 4294966784  ;;  %769 = vmatprep.subr.bf16.mxu0 %v1128_v0  ;;  %773 = vmatprep.mubr.msk.bf16.mxu0 %vm1129_vm0, %v1128_v0  ;;  %v353_v4 = vld [vmem:[%s297_s17] sm:$0xf]  ;;  %vm370_vm1 = vcmask 261120   ;;  %v887_v5 = vld [vmem:[#allocation7] sm:$0xff]  }
  0x73   : > { %777 = vmatprep.subr.bf16.mxu1 %v1128_v0  ;;  %781 = vmatprep.mubr.msk.bf16.mxu1 %vm1129_vm0, %v1128_v0  ;;  %v888_v6 = vld [vmem:[#allocation7 + $0x8] sm:$0xff]   ;;  %s1131_s28 = smov 112   ;;  %s347_s13 = scalar_lea.vmem [#allocation11], %s1357_s18  ;;  %vm433_vm2 = vcmask 125952  }
  0x74   : > { %770 = vmatpush3.bf16.msra.mxu0 %v885_v1  ;;  %423 = vrot.lane.b32.xlu0 %v414_v3, %s1130_s29  ;;  %s1376_s15 = sshll.u32 %s1113_s24, 6  ;;  %s333_s12 = scalar_lea.vmem [#allocation8], %s1357_s18 }
  0x75   : > { %771 = vmatprep.subr.bf16.mxu0 %v1128_v0  ;;  %778 = vmatpush3.bf16.msra.mxu1 %v887_v5  ;;  %s526_s8 = sshll.u32 %s333_s12, 4  ;;  %s1132_s19 = smov 96   ;;  %s1385_s8 = int_to_ptr.vmem [resolvable:$true] %s526_s8 }
  0x76   : > { %779 = vmatprep.subr.bf16.mxu1 %v1128_v0  ;;  %s1383_s7 = scalar_lea.hbm %s1506_s4, %s1376_s15  ;;  %s502_s24 = scalar_lea.sflag [#allocation4], %s1354_s16 }
  0x77   : > { %s975_s20 = scalar_lea.vmem %s1385_s8, 64  ;;  %p1525_p2 = scmp.ne.s32.totalorder %s1519_s10, 0 }
  0x78   : > { %772 = vmatpush3.bf16.msra.mxu0 %v886_v2  ;;  %p976_p11 = scmp.ne.s32.totalorder %s1385_s8, %s975_s20  ;;  %s1133_s29 = smov [#allocation8]  }
  0x79   : > { %780 = vmatpush3.bf16.msra.mxu1 %v888_v6 }
  0x7a   : > { %p977_p13 = pnand %p976_p11, %p1525_p2 }
  0x7b   : > { %774 = vmatmul.mubr.msk.bf16.vlgmr.msra.gmra.mrb[0].mxu0 %vm370_vm1, %v353_v4 }
  0x7c   : > { %782 = vmatmul.mubr.msk.bf16.vlgmr.msra.gmra.mrb[0].mxu1 %vm370_vm1, %v353_v4  ;;  %p978_p5 = pneg %p977_p13 }
  0xe6   : > { %v424_v7 = vpop.permute.xlu0 %423 }
 0x14e   : > { %v408_v8 = vpop.f32.mrb[0].mxu0 }
 0x14f   : > { %v426_v9 = vmul.f32 %v424_v7, %v408_v8  ;;  %v775_v10 = vpop.f32.mrb[1].mxu0  ;;  %v415_v11 = vmul.f32 %v414_v3, %v408_v8  ;;  %v493_v14 = vpop.f32.mrb[0].mxu1 }
 0x150   : > { %v411_v12 = vpop.f32.mrb[2].mxu0  ;;  %v499_v15 = vpack.c.bf16 %v493_v14, %v493_v14  ;;  %v783_v16 = vpop.f32.mrb[1].mxu1 }
 0x151   : > { %428 = vrot.lane.b32.xlu0 %v426_v9, %s1131_s28  ;;  %417 = vrot.lane.b32.xlu1 %v415_v11, %s1131_s28  ;;  %v776_v13 = vpop.f32.mrb[3].mxu0  ;;  %v496_v17 = vpop.f32.mrb[2].mxu1  ;;  %s979_s28 = sshll.u32 %s1133_s29, 4  ;;  %s980_s28 = int_to_ptr.vmem [resolvable:$false] %s979_s28 }
 0x152   : > { %500 = vst [vmem:[%s347_s13] sm:$0xf] %v499_v15  ;;  %v784_v18 = vpop.f32.mrb[3].mxu1  ;;  %p982_p7 = scmp.lt.s32.totalorder %s1385_s8, %s980_s28 }
 0x1c3   : > { %v429_v19 = vpop.permute.xlu0 %428  ;;  %v418_v20 = vpop.permute.xlu1 %417 }
 0x1c4   : > { %v431_v21 = vadd.f32 %v429_v19, %v426_v9  ;;  %v420_v22 = vadd.f32 %v418_v20, %v415_v11 }
 0x1c6   : > { %v762_v23 = vpack.c.bf16 %v431_v21, %v431_v21  ;;  %v421_v24 = vmul.f32 0.25, %v420_v22 }
 0x1c8   : > { %v432_v25 = vpack.c.bf16 %v421_v24, %v421_v24  ;;  %439 = vrot.lane.b32.xlu1 %v762_v23, %s1132_s19  ;;  %s981_s19 = scalar_lea.vmem %s980_s28, 128 }
 0x1c9   : > { %p983_p12 = scmp.lt.s32.totalorder %s981_s19, %s975_s20 }
 0x1ca   : > { %434 = vst.msk [vmem:[%s333_s12] sm:$0xf] %vm433_vm2, %v432_v25 }
 0x1cb   : > { %p984_p0 = por %p983_p12, %p982_p7 }
 0x1cd   : > { %p985_p1 = pnand %p984_p0, %p978_p5 }
 0x1cf   : > { %988 = shalt.err (!%p985_p1)
}
 0x1d0   : > { %s989_s16 = scalar_lea.hbm %s1383_s7, 64  ;;  %s993_s17 = scalar_lea.hbm %s1506_s4, 128 }
 0x1d1   : > { %p990_p6 = scmp.ne.s32.totalorder %s1383_s7, %s989_s16  ;;  %p994_p4 = scmp.lt.u32.totalorder %s1383_s7, %s1506_s4 }
 0x1d2   : > { %p995_p9 = scmp.lt.u32.totalorder %s993_s17, %s989_s16  ;;  %p997_p11 = scmp.lt.u32.totalorder %s989_s16, %s1383_s7 }
 0x1d3   : > { %p991_p10 = pnand %p990_p6, %p1525_p2 }
 0x1d4   : > { %p996_p8 = por %p995_p9, %p994_p4 }
 0x1d5   : > { %p992_p3 = pneg %p991_p10 }
 0x1d6   : > { %p998_p13 = por %p997_p11, %p996_p8 }
 0x1d8   : > { %p999_p5 = pnand %p998_p13, %p992_p3 }
 0x1da   : > { %1002 = shalt.err (!%p999_p5)
}
 0x1db   : > { %795 = dma.vmem_to_hbm [thread:$0]  (%p1525_p2), %s1385_s8, 64, %s1383_s7, %s502_s24  }
 0x1dc   : > { %s506_s20 = sand.u32 1, %s1202_s27   ;;  %s340_s19 = scalar_lea.vmem [#allocation9], %s1357_s18 }
 0x1dd   : > { %s540_s12 = sshll.u32 %s340_s19, 4  ;;  %s554_s9 = sshll.u32 %s347_s13, 4  ;;  %s1420_s12 = int_to_ptr.vmem [resolvable:$true] %s540_s12  ;;  %s1428_s9 = int_to_ptr.vmem [resolvable:$true] %s554_s9 }
 0x1de   : > { %s1418_s29 = scalar_lea.hbm %s1507_s5, %s1376_s15  ;;  %s1426_s8 = scalar_lea.hbm %s1508_s6, %s1376_s15 }
 0x1df   : > { %s1431_s27 = scalar_lea.sflag [#allocation10], %s506_s20  ;;  %s1003_s18 = scalar_lea.vmem %s1420_s12, 64 }
 0x1e0   : > { %p1004_p7 = scmp.ne.s32.totalorder %s1420_s12, %s1003_s18  ;;  %s1134_s13 = smov [#allocation9]  }
 0x1e1   : > { %s1007_s7 = sshll.u32 %s1134_s13, 4  ;;  %s1008_s7 = int_to_ptr.vmem [resolvable:$false] %s1007_s7 }
 0x1e2   : > { %p1005_p12 = pnand %p1004_p7, %p1525_p2  ;;  %s1009_s24 = scalar_lea.vmem %s1008_s7, 128 }
 0x1e3   : > { %p1010_p1 = scmp.lt.s32.totalorder %s1420_s12, %s1008_s7  ;;  %p1011_p6 = scmp.lt.s32.totalorder %s1009_s24, %s1003_s18 }
 0x1e4   : > { %p1006_p0 = pneg %p1005_p12 }
 0x1e5   : > { %p1012_p10 = por %p1011_p6, %p1010_p1 }
 0x1e7   : > { %p1013_p3 = pnand %p1012_p10, %p1006_p0 }
 0x23a   : > { %v440_v26 = vpop.permute.xlu1 %439 }
 0x23b   : > { %442 = vst.msk [vmem:[%s340_s19] sm:$0xf] %vm433_vm2, %v440_v26 }
 0x23c   : > { %1016 = shalt.err (!%p1013_p3)
}
 0x23d   : > { %s1017_s0 = scalar_lea.hbm %s1418_s29, 64  ;;  %s1021_s19 = scalar_lea.hbm %s1507_s5, 128 }
 0x23e   : > { %p1018_p4 = scmp.ne.s32.totalorder %s1418_s29, %s1017_s0  ;;  %p1022_p11 = scmp.lt.u32.totalorder %s1418_s29, %s1507_s5 }
 0x23f   : > { %p1023_p13 = scmp.lt.u32.totalorder %s1021_s19, %s1017_s0  ;;  %p1025_p7 = scmp.lt.u32.totalorder %s1017_s0, %s1418_s29 }
 0x240   : > { %p1019_p9 = pnand %p1018_p4, %p1525_p2 }
 0x241   : > { %p1024_p5 = por %p1023_p13, %p1022_p11 }
 0x242   : > { %p1020_p8 = pneg %p1019_p9 }
 0x243   : > { %p1026_p12 = por %p1025_p7, %p1024_p5 }
 0x245   : > { %p1027_p0 = pnand %p1026_p12, %p1020_p8 }
 0x247   : > { %1030 = shalt.err (!%p1027_p0)
}
 0x248   : > { %796 = dma.vmem_to_hbm [thread:$0]  (%p1525_p2), %s1420_s12, 64, %s1418_s29, %s1431_s27  }
 0x249   : > { %s1031_s28 = scalar_lea.vmem %s1428_s9, 64  ;;  %s1135_s18 = smov [#allocation11]  }
 0x24a   : > { %p1032_p1 = scmp.ne.s32.totalorder %s1428_s9, %s1031_s28  ;;  %s1035_s13 = sshll.u32 %s1135_s18, 4  ;;  %s1036_s13 = int_to_ptr.vmem [resolvable:$false] %s1035_s13 }
 0x24b   : > { %s1037_s7 = scalar_lea.vmem %s1036_s13, 128  ;;  %p1038_p3 = scmp.lt.s32.totalorder %s1428_s9, %s1036_s13 }
 0x24c   : > { %p1033_p6 = pnand %p1032_p1, %p1525_p2  ;;  %p1039_p4 = scmp.lt.s32.totalorder %s1037_s7, %s1031_s28 }
 0x24e   : > { %p1034_p10 = pneg %p1033_p6  ;;  %p1040_p9 = por %p1039_p4, %p1038_p3 }
 0x250   : > { %p1041_p8 = pnand %p1040_p9, %p1034_p10 }
 0x252   : > { %1044 = shalt.err (!%p1041_p8)
}
 0x253   : > { %s1045_s12 = scalar_lea.hbm %s1426_s8, 64  ;;  %s1049_s0 = scalar_lea.hbm %s1508_s6, 128 }
 0x254   : > { %p1046_p11 = scmp.ne.s32.totalorder %s1426_s8, %s1045_s12  ;;  %p1050_p7 = scmp.lt.u32.totalorder %s1426_s8, %s1508_s6 }
 0x255   : > { %p1051_p12 = scmp.lt.u32.totalorder %s1049_s0, %s1045_s12  ;;  %p1053_p1 = scmp.lt.u32.totalorder %s1045_s12, %s1426_s8 }
 0x256   : > { %p1047_p13 = pnand %p1046_p11, %p1525_p2 }
 0x257   : > { %p1052_p0 = por %p1051_p12, %p1050_p7 }
 0x258   : > { %p1048_p5 = pneg %p1047_p13 }
 0x259   : > { %p1054_p6 = por %p1053_p1, %p1052_p0 }
 0x25b   : > { %p1055_p10 = pnand %p1054_p6, %p1048_p5 }
 0x25d   : > { %1058 = shalt.err (!%p1055_p10)
}
 0x25e   : > { %797 = dma.vmem_to_hbm [thread:$0]  (%p1525_p2), %s1428_s9, 64, %s1426_s8, %s1431_s27  }
 0x25f PF: > { %s566_s19 = sand.u32 1, %s1101_s21   ;;  %p1526_p3 = scmp.ne.s32.totalorder %s1515_s30, 0 }
 0x260   : > { %p1527_p4 = scmp.ge.s32.totalorder %s1121_s26, 2  ;;  %s567_s16 = scalar_lea.sflag [#allocation4], %s566_s19 }
 0x262   : > { %p813_p9 = pnand %p1527_p4, %p1526_p3 }
 0x264   : > { %1092 = dma.done.wait (!%p813_p9), %s567_s16, 64  }
 0x265   : > { %1094 = vsyncadd (!%p813_p9), %s567_s16, 4294967232  ;;  %s1528_s17 = sadd.s32 4294967294, %s1121_s26  }
 0x266   : > { %s575_s28 = sand.u32 1, %s1528_s17  }
 0x267   : > { %s576_s18 = scalar_lea.sflag [#allocation10], %s575_s28 }
 0x268   : > { %1096 = dma.done.wait (!%p813_p9), %s576_s18, 128  }
 0x269   : > { %1098 = vsyncadd (!%p813_p9), %s576_s18, 4294967168  ;;  %s27_s26 = sadd.s32 1, %s1121_s26   ;;  %s1529_s21 = smov %s1105_s22 }
 0x26a   : > { %p24_p2 = scmp.ge.s32.totalorder %s27_s26, 4   ;;  %s1530_s22 = smov %s1109_s23 }
 0x26b   : > { %s1531_s23 = smov %s1311_s11  ;;  %s1532_s24 = smov %s1117_s25 }
 0x26c   : > { %s1533_s25 = smov %s1535_s14  ;;  %26 = sbr.rel (!%p24_p2) target bundleno = 11 (0xb), region = 124 }
 0x273   :  { %590 = vsyncpa [#allocation3], 1 }
 0x274   :  { %592 = vsyncpa [#allocation3 + $0x1], 1 }
 0x275   :  { %593 = vsyncpa [#allocation6], 1 }
 0x276   :  { %594 = vsyncpa [#allocation4], 1 }
 0x277   :  { %596 = vsyncpa [#allocation4 + $0x1], 1 }
 0x278   :  { %597 = vsyncpa [#allocation10], 1 }
 0x279   :  { %599 = vsyncpa [#allocation10 + $0x1], 1 }

</bundles_post_ra>
